<compile_context>
chip_gen: v5e
topology: v5e:2x2
jax: 0.10.0
libtpu: 0.0.40
codegen_flags: <defaults>
</compile_context>

<pallas_src>
import jax
import jax.numpy as jnp
from jax.experimental import pallas as pl
from jax.experimental.pallas import tpu as pltpu


# ----------------------------------------------------------------------------
# Kernel
# ----------------------------------------------------------------------------
def _autoencoder_kernel(
    x_ref,            # (TILE_B, D_pad)   f32
    w1_ref, b1_ref,   # (D_pad, H) bf16 , (1, H) f32      encoder Linear 1
    w23_ref, b23_ref, # (H, H)     bf16 , (1, H) f32      fused Linear2 @ Linear3
    w4_ref, b4_ref,   # (H, D_pad) bf16 , (1, D_pad) f32  decoder Linear 2
    out_ref,          # (TILE_B, D_pad)   f32
):
    x = x_ref[...].astype(jnp.bfloat16)

    # encoder layer 1: input_dim -> 64, ReLU     (bf16 MXU, f32 accumulate)
    h1 = jnp.dot(x, w1_ref[...], preferred_element_type=jnp.float32)
    h1 = jnp.maximum(h1 + b1_ref[...], 0.0)

    # fused encoder-layer-2 / decoder-layer-1 (no activation between), ReLU
    h2 = jnp.dot(h1.astype(jnp.bfloat16), w23_ref[...],
                 preferred_element_type=jnp.float32)
    h2 = jnp.maximum(h2 + b23_ref[...], 0.0)

    # decoder layer 2: 64 -> input_dim
    y = jnp.dot(h2.astype(jnp.bfloat16), w4_ref[...],
                preferred_element_type=jnp.float32) + b4_ref[...]

    out_ref[...] = y.astype(out_ref.dtype)


# ----------------------------------------------------------------------------
# Wrapper
# ----------------------------------------------------------------------------
def _round_up(n, m):
    return ((n + m - 1) // m) * m


def _pad_axis(a, axis, mult):
    pad = (-a.shape[axis]) % mult
    if pad == 0:
        return a
    widths = [(0, 0)] * a.ndim
    widths[axis] = (0, pad)
    return jnp.pad(a, widths)


def rtl_autoencoder_forward(x, params, *, tile_b=256):
    """x: [batch, input_dim] float32.
    params: dict of (in, out) weights w1..w4 and (1, out) biases b1..b4
    (i.e. PyTorch's W.T / b, so y = x @ W + b)."""
    batch, input_dim = x.shape
    hidden = params["w1"].shape[1]

    # --- one-time weight prep: fuse the activation-free middle pair (f32) ---
    w1 = params["w1"].astype(jnp.float32)
    b1 = params["b1"].astype(jnp.float32)
    w23 = params["w2"].astype(jnp.float32) @ params["w3"].astype(jnp.float32)
    b23 = params["b2"].astype(jnp.float32) @ params["w3"].astype(jnp.float32) \
        + params["b3"].astype(jnp.float32)
    w4 = params["w4"].astype(jnp.float32)
    b4 = params["b4"].astype(jnp.float32)

    # --- lane-dense feature dim (multiple of 128) and sublane-aligned batch ---
    d_pad = _round_up(input_dim, 128)
    b_pad = _round_up(batch, tile_b)

    x_p = _pad_axis(_pad_axis(x, 1, 128), 0, tile_b)   # (b_pad, d_pad)
    w1_p = _pad_axis(w1, 0, 128)                       # (d_pad, hidden)
    w4_p = _pad_axis(w4, 1, 128)                       # (hidden, d_pad)
    b4_p = _pad_axis(b4, 1, 128)                       # (1, d_pad)

    # --- bf16 matmul operands, cast once here (not per grid step) ---
    w1_bf = w1_p.astype(jnp.bfloat16)
    w23_bf = w23.astype(jnp.bfloat16)
    w4_bf = w4_p.astype(jnp.bfloat16)

    grid = (b_pad // tile_b,)

    # Resident (constant index_map) weight/bias specs.
    def const2d(shape):
        return pl.BlockSpec(shape, lambda i: (0, 0))

    in_specs = [
        pl.BlockSpec((tile_b, d_pad), lambda i: (i, 0)),   # x tile
        const2d((d_pad, hidden)),                          # w1 (bf16)
        const2d((1, hidden)),                              # b1 (f32)
        const2d((hidden, hidden)),                         # w23 (bf16)
        const2d((1, hidden)),                              # b23 (f32)
        const2d((hidden, d_pad)),                          # w4 (bf16)
        const2d((1, d_pad)),                               # b4 (f32)
    ]
    out_specs = pl.BlockSpec((tile_b, d_pad), lambda i: (i, 0))

    # VMEM budget: double-buffered x/out tiles + resident bf16 weights + slack.
    bytes_needed = (
        2 * tile_b * d_pad * 4                 # x tile (double buffered)
        + 2 * tile_b * d_pad * 4               # out tile (double buffered)
        + 2 * 2 * (d_pad * hidden + hidden * hidden + hidden * d_pad)  # bf16 W
        + 2 * 4 * (2 * hidden + d_pad)         # f32 biases
        + 4 * tile_b * max(hidden, d_pad) * 4  # f32/bf16 intermediates headroom
    )
    vmem_limit = int(min(64 * 1024 * 1024,
                         max(2 * bytes_needed, 16 * 1024 * 1024)))

    out_padded = pl.pallas_call(
        _autoencoder_kernel,
        out_shape=jax.ShapeDtypeStruct((b_pad, d_pad), x.dtype),
        grid=grid,
        in_specs=in_specs,
        out_specs=out_specs,
        compiler_params=pltpu.CompilerParams(
            dimension_semantics=("parallel",),   # v7x: split tiles across 2 TCs
            vmem_limit_bytes=vmem_limit,
        ),
    )(x_p, w1_bf, b1, w23_bf, b23, w4_bf, b4_p)

    return out_padded[:batch, :input_dim]


# ----------------------------------------------------------------------------
# Params & reference
# ----------------------------------------------------------------------------
def init_params(key, input_dim, latent_dim=32, hidden=64):
    """Deterministic synthetic init (Kaiming-uniform-ish like PyTorch defaults)."""
    def linear(key, fan_in, fan_out):
        kw, kb = jax.random.split(key)
        bound = 1.0 / jnp.sqrt(jnp.float32(fan_in))
        w = jax.random.uniform(kw, (fan_in, fan_out), jnp.float32, -bound, bound)
        b = jax.random.uniform(kb, (1, fan_out), jnp.float32, -bound, bound)
        return w, b

    k1, k2, k3, k4 = jax.random.split(key, 4)
    w1, b1 = linear(k1, input_dim, hidden)
    w2, b2 = linear(k2, hidden, latent_dim)
    w3, b3 = linear(k3, latent_dim, hidden)
    w4, b4 = linear(k4, hidden, input_dim)
    return dict(w1=w1, b1=b1, w2=w2, b2=b2, w3=w3, b3=b3, w4=w4, b4=b4)


def _reference_forward(x, p):
    """Plain-JAX f32 reference matching the PyTorch module (unfused)."""
    h1 = jnp.maximum(x @ p["w1"] + p["b1"], 0.0)
    z = h1 @ p["w2"] + p["b2"]
    h2 = jnp.maximum(z @ p["w3"] + p["b3"], 0.0)
    return h2 @ p["w4"] + p["b4"]


# ----------------------------------------------------------------------------
# Demo / self-check
# ----------------------------------------------------------------------------
if __name__ == "__main__":
    batch = 500          # exercises batch padding (padded to 512 -> 2 grid steps)
    input_dim = 128      # already a multiple of 128 (lane-dense output)
    latent_dim = 32

    key = jax.random.PRNGKey(0)
    kx, kp = jax.random.split(key)

    x = jax.random.normal(kx, (batch, input_dim), dtype=jnp.float32)
    params = init_params(kp, input_dim, latent_dim)

    out = rtl_autoencoder_forward(x, params, tile_b=256)
    out = jax.block_until_ready(out)

    # Semantics check vs. plain-JAX f32 reference.  Tolerance is loosened
    # relative to exact f32 because the kernel runs bf16 matmul operands
    # (f32 accumulation) and fuses the activation-free middle layer pair.
    ref = _reference_forward(x, params)
    assert out.shape == (batch, input_dim)
    assert jnp.allclose(out, ref, atol=5e-2, rtol=5e-2), (
        float(jnp.max(jnp.abs(out - ref)))
    )

    print("KERNEL_OK")
</pallas_src>

<mosaic_0001>
module attributes {stable_mosaic.version = 11 : i64} {
  func.func @_autoencoder_kernel(%arg0: i32, %arg1: memref<256x128xf32, #tpu.memory_space<vmem>>, %arg2: memref<128x64xbf16, #tpu.memory_space<vmem>>, %arg3: memref<1x64xf32, #tpu.memory_space<vmem>>, %arg4: memref<64x64xbf16, #tpu.memory_space<vmem>>, %arg5: memref<1x64xf32, #tpu.memory_space<vmem>>, %arg6: memref<64x128xbf16, #tpu.memory_space<vmem>>, %arg7: memref<1x128xf32, #tpu.memory_space<vmem>>, %arg8: memref<256x128xf32, #tpu.memory_space<vmem>>) attributes {dimension_semantics = [#tpu.dimension_semantics<parallel>], iteration_bounds = array<i64: 2>, scalar_prefetch = 0 : i64, scratch_operands = 0 : i64, tpu.core_type = #tpu.core_type<tc>, window_params = [{transform_indices = @transform_0, window_bounds = array<i64: 256, 128>}, {pipeline_mode = #tpu.pipeline_mode<synchronous>, transform_indices = @transform_1, window_bounds = array<i64: 128, 64>}, {pipeline_mode = #tpu.pipeline_mode<synchronous>, transform_indices = @transform_2, window_bounds = array<i64: 1, 64>}, {pipeline_mode = #tpu.pipeline_mode<synchronous>, transform_indices = @transform_3, window_bounds = array<i64: 64, 64>}, {pipeline_mode = #tpu.pipeline_mode<synchronous>, transform_indices = @transform_4, window_bounds = array<i64: 1, 64>}, {pipeline_mode = #tpu.pipeline_mode<synchronous>, transform_indices = @transform_5, window_bounds = array<i64: 64, 128>}, {pipeline_mode = #tpu.pipeline_mode<synchronous>, transform_indices = @transform_6, window_bounds = array<i64: 1, 128>}, {transform_indices = @transform_7, window_bounds = array<i64: 256, 128>}]} {
    %c0 = arith.constant 0 : index
    %c0_0 = arith.constant 0 : index
    %0 = vector.load %arg1[%c0, %c0_0] : memref<256x128xf32, #tpu.memory_space<vmem>>, vector<256x128xf32>
    %1 = arith.truncf %0 : vector<256x128xf32> to vector<256x128xbf16>
    %c0_1 = arith.constant 0 : index
    %c0_2 = arith.constant 0 : index
    %2 = vector.load %arg2[%c0_1, %c0_2] : memref<128x64xbf16, #tpu.memory_space<vmem>>, vector<128x64xbf16>
    %cst = arith.constant dense<0.000000e+00> : vector<256x64xf32>
    %3 = tpu.matmul %1, %2, %cst {dimension_numbers = #tpu.dot_dimension_numbers<[1], [0], [0], [1], [0, 0, 1, 1], [], []>} : vector<256x128xbf16>, vector<128x64xbf16>, vector<256x64xf32> -> vector<256x64xf32>
    %c0_3 = arith.constant 0 : index
    %c0_4 = arith.constant 0 : index
    %4 = vector.load %arg3[%c0_3, %c0_4] : memref<1x64xf32, #tpu.memory_space<vmem>>, vector<1x64xf32>
    %5 = vector.broadcast %4 : vector<1x64xf32> to vector<256x64xf32>
    %6 = arith.addf %3, %5 : vector<256x64xf32>
    %cst_5 = arith.constant 0.000000e+00 : f32
    %7 = vector.broadcast %cst_5 : f32 to vector<256x64xf32>
    %8 = arith.maximumf %6, %7 : vector<256x64xf32>
    %9 = arith.truncf %8 : vector<256x64xf32> to vector<256x64xbf16>
    %c0_6 = arith.constant 0 : index
    %c0_7 = arith.constant 0 : index
    %10 = vector.load %arg4[%c0_6, %c0_7] : memref<64x64xbf16, #tpu.memory_space<vmem>>, vector<64x64xbf16>
    %cst_8 = arith.constant dense<0.000000e+00> : vector<256x64xf32>
    %11 = tpu.matmul %9, %10, %cst_8 {dimension_numbers = #tpu.dot_dimension_numbers<[1], [0], [0], [1], [0, 0, 1, 1], [], []>} : vector<256x64xbf16>, vector<64x64xbf16>, vector<256x64xf32> -> vector<256x64xf32>
    %c0_9 = arith.constant 0 : index
    %c0_10 = arith.constant 0 : index
    %12 = vector.load %arg5[%c0_9, %c0_10] : memref<1x64xf32, #tpu.memory_space<vmem>>, vector<1x64xf32>
    %13 = vector.broadcast %12 : vector<1x64xf32> to vector<256x64xf32>
    %14 = arith.addf %11, %13 : vector<256x64xf32>
    %cst_11 = arith.constant 0.000000e+00 : f32
    %15 = vector.broadcast %cst_11 : f32 to vector<256x64xf32>
    %16 = arith.maximumf %14, %15 : vector<256x64xf32>
    %17 = arith.truncf %16 : vector<256x64xf32> to vector<256x64xbf16>
    %c0_12 = arith.constant 0 : index
    %c0_13 = arith.constant 0 : index
    %18 = vector.load %arg6[%c0_12, %c0_13] : memref<64x128xbf16, #tpu.memory_space<vmem>>, vector<64x128xbf16>
    %cst_14 = arith.constant dense<0.000000e+00> : vector<256x128xf32>
    %19 = tpu.matmul %17, %18, %cst_14 {dimension_numbers = #tpu.dot_dimension_numbers<[1], [0], [0], [1], [0, 0, 1, 1], [], []>} : vector<256x64xbf16>, vector<64x128xbf16>, vector<256x128xf32> -> vector<256x128xf32>
    %c0_15 = arith.constant 0 : index
    %c0_16 = arith.constant 0 : index
    %20 = vector.load %arg7[%c0_15, %c0_16] : memref<1x128xf32, #tpu.memory_space<vmem>>, vector<1x128xf32>
    %21 = vector.broadcast %20 : vector<1x128xf32> to vector<256x128xf32>
    %22 = arith.addf %19, %21 : vector<256x128xf32>
    %c0_17 = arith.constant 0 : index
    %c0_18 = arith.constant 0 : index
    %23 = vector.load %arg8[%c0_17, %c0_18] : memref<256x128xf32, #tpu.memory_space<vmem>>, vector<256x128xf32>
    tpu.vector_store %arg8[%c0_17, %c0_18], %22 {strides = array<i32>} : memref<256x128xf32, #tpu.memory_space<vmem>>, vector<256x128xf32>,
    return
  }
  func.func @transform_0(%arg0: i32) -> (i32, i32) {
    %c0_i32 = arith.constant 0 : i32
    %c0_i32_0 = arith.constant 0 : i32
    return %arg0, %c0_i32 : i32, i32
  }
  func.func @transform_1(%arg0: i32) -> (i32, i32) {
    %c0_i32 = arith.constant 0 : i32
    %c0_i32_0 = arith.constant 0 : i32
    %c0_i32_1 = arith.constant 0 : i32
    return %c0_i32, %c0_i32_0 : i32, i32
  }
  func.func @transform_2(%arg0: i32) -> (i32, i32) {
    %c0_i32 = arith.constant 0 : i32
    %c0_i32_0 = arith.constant 0 : i32
    %c0_i32_1 = arith.constant 0 : i32
    return %c0_i32, %c0_i32_0 : i32, i32
  }
  func.func @transform_3(%arg0: i32) -> (i32, i32) {
    %c0_i32 = arith.constant 0 : i32
    %c0_i32_0 = arith.constant 0 : i32
    %c0_i32_1 = arith.constant 0 : i32
    return %c0_i32, %c0_i32_0 : i32, i32
  }
  func.func @transform_4(%arg0: i32) -> (i32, i32) {
    %c0_i32 = arith.constant 0 : i32
    %c0_i32_0 = arith.constant 0 : i32
    %c0_i32_1 = arith.constant 0 : i32
    return %c0_i32, %c0_i32_0 : i32, i32
  }
  func.func @transform_5(%arg0: i32) -> (i32, i32) {
    %c0_i32 = arith.constant 0 : i32
    %c0_i32_0 = arith.constant 0 : i32
    %c0_i32_1 = arith.constant 0 : i32
    return %c0_i32, %c0_i32_0 : i32, i32
  }
  func.func @transform_6(%arg0: i32) -> (i32, i32) {
    %c0_i32 = arith.constant 0 : i32
    %c0_i32_0 = arith.constant 0 : i32
    %c0_i32_1 = arith.constant 0 : i32
    return %c0_i32, %c0_i32_0 : i32, i32
  }
  func.func @transform_7(%arg0: i32) -> (i32, i32) {
    %c0_i32 = arith.constant 0 : i32
    %c0_i32_0 = arith.constant 0 : i32
    return %arg0, %c0_i32 : i32, i32
  }
}

</mosaic_0001>

<bundles_post_ra>
// kernel: tpu_custom_call.1
= control target key start
LH: loop header
LB: loop body
LE: loop exit
PB: predicated region body
PF: predicated region fallthrough
CT: control target
= control target key end

     0   :  { %12 = vsyncpa [#allocation3], 0  ;;  %s1804_s0 = inlined_call_operand.hbm [shape: f32[512,128], index: 0, kind: input, shape index: {}]   ;;  %s1805_s1 = inlined_call_operand.vmem [shape: bf16[128,64], index: 1, kind: input, shape index: {}]   ;;  %s1806_s2 = inlined_call_operand.vmem [shape: f32[1,64], index: 2, kind: input, shape index: {}]   ;;  %s1807_s3 = inlined_call_operand.vmem [shape: bf16[64,64], index: 3, kind: input, shape index: {}]   ;;  %s1808_s4 = inlined_call_operand.vmem [shape: f32[1,64], index: 4, kind: input, shape index: {}]   ;;  %s1809_s5 = inlined_call_operand.vmem [shape: bf16[64,128], index: 5, kind: input, shape index: {}]   ;;  %s1810_s6 = inlined_call_operand.vmem [shape: f32[1,128], index: 6, kind: input, shape index: {}]   ;;  %s1811_s7 = inlined_call_operand.hbm [shape: f32[512,128], index: 7, kind: output, shape index: {}]  }
   0x1   :  { %14 = vsyncpa [#allocation3 + $0x1], 0 }
   0x2   :  { %15 = vsyncpa [#allocation4], 0 }
   0x3   :  { %17 = vsyncpa [#allocation4 + $0x1], 0  ;;  %s1410_s24 = smov 0   ;;  %s1412_s25 = smov 0  }
   0x4   :  { %s1414_s26 = smov 0   ;;  %s1416_s27 = smov 0  }
   0x5 LB: > { %s1431_s28 = sadd.s32 4294967295, %s1364_s27   ;;  %s1071_s29 = sadd.s32 4294967294, %s1364_s27   ;;  %s1364_s27 = sphi %s1416_s27, %s1823_s27   ;;  %s1360_s26 = sphi %s1414_s26, %s1822_s26   ;;  %s1356_s25 = sphi %s1412_s25, %s1821_s25   ;;  %s1352_s24 = sphi %s1410_s24, %s1820_s24  }
   0x6   : > { %s1435_s30 = sadd.s32 1, %s1364_s27   ;;  %s30_s8 = sadd.s32 1, %s1360_s26 }
   0x7   : > { %s27_s9 = ssub.s32 %s1364_s27, %s1435_s30  ;;  %p37_p0 = scmp.ne.s32.totalorder %s1360_s26, %s1356_s25 }
   0x8   : > { %p28_p1 = scmp.eq.s32.totalorder %s27_s9, 0  ;;  %p38_p2 = scmp.eq.s32.totalorder %s1364_s27, 0 }
   0x9   : > { %p43_p3 = scmp.ne.s32.totalorder %s1356_s25, %s1352_s24  ;;  %p44_p4 = scmp.eq.s32.totalorder %s1431_s28, 0 }
   0xa   : > { %s1447_s10 = scalar_select %p28_p1, %s1360_s26, %s30_s8  }
   0xb   : > { %p1449_p5 = por %p38_p2, %p37_p0  ;;  %p1453_p6 = por %p44_p4, %p43_p3 }
   0xc   : > { %1812 = sst [smem:[#allocation8_spill]] %s1447_s10  ;;  %p193_p7 = scmp.eq.s32.totalorder %s1431_s28, 1 }
   0xd   : > { %p199_p8 = scmp.eq.s32.totalorder %s1071_s29, 1  ;;  %p1227_p10 = scmp.lt.s32.totalorder %s1364_s27, 2 }
   0xe   : > { %p1460_p11 = por %p193_p7, %p37_p0  ;;  %s237_s15 = sand.u32 1, %s1360_s26  }
   0xf   : > { %p1464_p12 = por %p199_p8, %p43_p3  ;;  %s1181_s16 = sshll.u32 %s1364_s27, 8 }
  0x10   : > { %s1074_s17 = sshll.u32 %s237_s15, 8  ;;  %s246_s20 = scalar_lea.hbm %s1804_s0, %s1181_s16 }
  0x11   : > { %s247_s21 = sshll.u32 %s246_s20, 4  ;;  %s241_s22 = scalar_lea.vmem [#allocation2], %s1074_s17  ;;  %s248_s21 = int_to_ptr.hbm [resolvable:$true] %s247_s21 }
  0x12   : > { %s249_s23 = sshll.u32 %s241_s22, 4  ;;  %p1475_p13 = pnand %p1227_p10, %p1449_p5  ;;  %s250_s23 = int_to_ptr.vmem [resolvable:$true] %s249_s23 }
  0x13   : > { %p1077_p0 = scmp.ge.s32.totalorder %s1364_s27, 1  ;;  %p257_p1 = scmp.lt.s32.totalorder %s1364_s27, 3 }
  0x14   : > { %s238_s8 = scalar_lea.sflag [#allocation3], %s237_s15  ;;  %s1268_s9 = sshra.s32 %s248_s21, 4  ;;  %s1269_s9 = int_to_ptr.hbm [resolvable:$true] %s1268_s9 }
  0x15   : > { %s1270_s10 = scalar_lea.hbm %s1269_s9, 256  ;;  %p1272_p3 = pneg %p1475_p13 }
  0x16   : > { %p1271_p2 = scmp.ne.s32.totalorder %s1269_s9, %s1270_s10  ;;  %s1275_s11 = scalar_lea.hbm %s1804_s0, 512 }
  0x17   : > { %p1276_p5 = scmp.lt.s32.totalorder %s1269_s9, %s1804_s0  ;;  %p1277_p8 = scmp.lt.s32.totalorder %s1275_s11, %s1270_s10 }
  0x18   : > { %p1273_p4 = pnand %p1272_p3, %p1271_p2 }
  0x19   : > { %p1278_p10 = por %p1277_p8, %p1276_p5 }
  0x1a   : > { %p1274_p7 = pneg %p1273_p4 }
  0x1c   : > { %p1279_p9 = pnand %p1278_p10, %p1274_p7 }
  0x1e   : > { %1282 = shalt.err (!%p1279_p9)
}
  0x1f   : > { %s1366_s15 = smov 128   ;;  %s1367_s20 = smov 8  }
  0x20   : > { %1222 = dma.hbm_to_vmem [thread:$0]  (!%p1475_p13), %s248_s21, 4096, %s250_s23, %s238_s8, %s1366_s15, %s1366_s15, %s1367_s20  }
  0x21   : > { %p258_p2 = pnand %p1077_p0, %p257_p1 }
  0x22   : > { %s1496_s22 = sand.u32 (!%p258_p2), 1, %s1356_s25  }
  0x23   : > { %261 = sbr.rel (%p258_p2) target bundleno = 691 (0x2b3), region = 48  ;;  %s1078_s10 = sshll.u32 (!%p258_p2), %s1496_s22, 8 }
  0x24   : > { %s264_s9 = scalar_lea.sflag (!%p258_p2), [#allocation3], %s1496_s22  ;;  %s1502_s16 = scalar_lea.vmem (!%p258_p2), [#allocation2], %s1078_s10 }
  0x28   : > { %1343 = dma.done.wait (%p1453_p6), %s264_s9, 4096  }
  0x29   : > { %1345 = vsyncadd (%p1453_p6), %s264_s9, 4294963200  ;;  %v1189_v0 = vld [vmem:[%s1805_s1 + $0x38] sm:$0xff]  ;;  %v1188_v1 = vld [vmem:[%s1805_s1 + $0x30] sm:$0xff]  ;;  %vm591_vm0 = vcmask 523264   ;;  %s1692_s23 = scalar_lea.vmem [#allocation5], %s1078_s10  ;;  %s1198_s10 = sshll.u32 %s1431_s28, 8 }
  0x2a   : > { %418 = vmatpush.bf16.msra.mxu0 %v1189_v0  ;;  %1199 = vmatpush.bf16.msra.mxu3 %v1189_v0  ;;  %v1187_v2 = vld [vmem:[%s1805_s1 + $0x28] sm:$0xff]  ;;  %v1186_v3 = vld [vmem:[%s1805_s1 + $0x20] sm:$0xff]  ;;  %v1185_v4 = vld [vmem:[%s1805_s1 + $0x18] sm:$0xff]  ;;  %s994_s8 = scalar_lea.hbm %s1811_s7, %s1198_s10  ;;  %s995_s17 = sshll.u32 %s1692_s23, 4  ;;  %s996_s17 = int_to_ptr.vmem [resolvable:$true] %s995_s17 }
  0x2b   : > { %v1184_v5 = vld [vmem:[%s1805_s1 + $0x10] sm:$0xff]  ;;  %v1183_v6 = vld [vmem:[%s1805_s1 + $0x8] sm:$0xff]  ;;  %v1182_v7 = vld [vmem:[%s1805_s1] sm:$0xff]  ;;  %s997_s11 = sshll.u32 %s994_s8, 4  ;;  %s983_s12 = scalar_lea.sflag [#allocation4], %s1496_s22  ;;  %s998_s11 = int_to_ptr.hbm [resolvable:$true] %s997_s11 }
  0x2c   : > { %v302_v8 = vld [vmem:[%s1502_s16] sm:$0xff]  ;;  %v303_v9 = vld [vmem:[%s1502_s16 + $0x8] sm:$0xff]  ;;  %v304_v11 = vld [vmem:[%s1502_s16 + $0x10] sm:$0xff]  ;;  %s1312_s18 = sshra.s32 %s998_s11, 4  ;;  %s1318_s20 = scalar_lea.hbm %s1811_s7, 512  ;;  %s1313_s18 = int_to_ptr.hbm [resolvable:$true] %s1312_s18 }
  0x2d   : > { %v334_v10 = vpack.c.bf16 %v303_v9, %v302_v8  ;;  %v305_v12 = vld [vmem:[%s1502_s16 + $0x18] sm:$0xff]  ;;  %v306_v14 = vld [vmem:[%s1502_s16 + $0x20] sm:$0xff]  ;;  %v307_v15 = vld [vmem:[%s1502_s16 + $0x28] sm:$0xff]  ;;  %s1314_s28 = scalar_lea.hbm %s1313_s18, 256  ;;  %p1319_p0 = scmp.lt.s32.totalorder %s1313_s18, %s1811_s7 }
  0x2e   : > { %419 = vmatpush.bf16.msra.mxu0 %v1188_v1  ;;  %1200 = vmatpush.bf16.msra.mxu3 %v1188_v1  ;;  %v335_v13 = vpack.c.bf16 %v305_v12, %v304_v11  ;;  %v336_v16 = vpack.c.bf16 %v307_v15, %v306_v14  ;;  %v308_v17 = vld [vmem:[%s1502_s16 + $0x30] sm:$0xff]  ;;  %v309_v18 = vld [vmem:[%s1502_s16 + $0x38] sm:$0xff]  ;;  %v310_v20 = vld [vmem:[%s1502_s16 + $0x40] sm:$0xff]  ;;  %p1315_p6 = scmp.ne.s32.totalorder %s1313_s18, %s1314_s28  ;;  %p1320_p1 = scmp.lt.s32.totalorder %s1318_s20, %s1314_s28 }
  0x2f   : > { %v337_v19 = vpack.c.bf16 %v309_v18, %v308_v17  ;;  %v311_v21 = vld [vmem:[%s1502_s16 + $0x48] sm:$0xff]  ;;  %v326_v23 = vld [vmem:[%s1502_s16 + $0xc0] sm:$0xff]  ;;  %v312_v26 = vld [vmem:[%s1502_s16 + $0x50] sm:$0xff] }
  0x30   : > { %v338_v22 = vpack.c.bf16 %v311_v21, %v310_v20  ;;  %v327_v24 = vld [vmem:[%s1502_s16 + $0xc8] sm:$0xff]  ;;  %v313_v27 = vld [vmem:[%s1502_s16 + $0x58] sm:$0xff]  ;;  %v328_v29 = vld [vmem:[%s1502_s16 + $0xd0] sm:$0xff]  ;;  %p1316_p9 = pnand %p1315_p6, %p1460_p11  ;;  %p1321_p3 = por %p1320_p1, %p1319_p0 }
  0x31   : > { %v346_v25 = vpack.c.bf16 %v327_v24, %v326_v23  ;;  %v339_v28 = vpack.c.bf16 %v313_v27, %v312_v26  ;;  %v329_v30 = vld [vmem:[%s1502_s16 + $0xd8] sm:$0xff]  ;;  %v314_v32 = vld [vmem:[%s1502_s16 + $0x60] sm:$0xff]  ;;  %v315_v33 = vld [vmem:[%s1502_s16 + $0x68] sm:$0xff] }
  0x32   : > { %420 = vmatpush.bf16.msra.mxu0 %v1187_v2  ;;  %1201 = vmatpush.bf16.msra.mxu3 %v1187_v2  ;;  %v347_v31 = vpack.c.bf16 %v329_v30, %v328_v29  ;;  %v1193_v34 = vld [vmem:[%s1807_s3 + $0x18] sm:$0xff]  ;;  %v340_v35 = vpack.c.bf16 %v315_v33, %v314_v32  ;;  %v1192_v36 = vld [vmem:[%s1807_s3 + $0x10] sm:$0xff]  ;;  %v1191_v37 = vld [vmem:[%s1807_s3 + $0x8] sm:$0xff]  ;;  %p1317_p13 = pneg %p1316_p9 }
  0x33   : > { %644 = vmatpush.bf16.msra.mxu1 %v1193_v34  ;;  %v1190_v38 = vld [vmem:[%s1807_s3] sm:$0xff]  ;;  %v316_v39 = vld [vmem:[%s1502_s16 + $0x70] sm:$0xff]  ;;  %v317_v40 = vld [vmem:[%s1502_s16 + $0x78] sm:$0xff] }
  0x34   : > { %v330_v41 = vld [vmem:[%s1502_s16 + $0xe0] sm:$0xff]  ;;  %v331_v42 = vld [vmem:[%s1502_s16 + $0xe8] sm:$0xff]  ;;  %v341_v44 = vpack.c.bf16 %v317_v40, %v316_v39  ;;  %v332_v47 = vld [vmem:[%s1502_s16 + $0xf0] sm:$0xff]  ;;  %p1322_p4 = pnand %p1321_p3, %p1317_p13 }
  0x35   : > { %v348_v43 = vpack.c.bf16 %v331_v42, %v330_v41  ;;  %v318_v45 = vld [vmem:[%s1502_s16 + $0x80] sm:$0xff]  ;;  %v319_v46 = vld [vmem:[%s1502_s16 + $0x88] sm:$0xff]  ;;  %v333_v48 = vld [vmem:[%s1502_s16 + $0xf8] sm:$0xff] }
  0x36   : > { %421 = vmatpush.bf16.msra.mxu0 %v1186_v3  ;;  %1202 = vmatpush.bf16.msra.mxu3 %v1186_v3  ;;  %v349_v49 = vpack.c.bf16 %v333_v48, %v332_v47  ;;  %v342_v50 = vpack.c.bf16 %v319_v46, %v318_v45  ;;  %v1573_v52 = vld [vmem:[%s1806_s2] ss:$0 sm:$0xff]  ;;  %v320_v58 = vld [vmem:[%s1502_s16 + $0x90] sm:$0xff]  ;;  %v321_v59 = vld [vmem:[%s1502_s16 + $0x98] sm:$0xff] }
  0x37   : > { %645 = vmatpush.bf16.msra.mxu1 %v1192_v36  ;;  %v343_v61 = vpack.c.bf16 %v321_v59, %v320_v58  ;;  %v324_v14 = vld [vmem:[%s1502_s16 + $0xb0] sm:$0xff]  ;;  %v325_v15 = vld [vmem:[%s1502_s16 + $0xb8] sm:$0xff] }
  0x38   : > { %v345_v17 = vpack.c.bf16 %v325_v15, %v324_v14 }
  0x3a   : > { %422 = vmatpush.bf16.msra.mxu0 %v1185_v4  ;;  %1203 = vmatpush.bf16.msra.mxu3 %v1185_v4  ;;  %v322_v4 = vld [vmem:[%s1502_s16 + $0xa0] sm:$0xff] }
  0x3b   : > { %646 = vmatpush.bf16.msra.mxu1 %v1191_v37 }
  0x3e   : > { %423 = vmatpush.bf16.msra.mxu0 %v1184_v5  ;;  %1204 = vmatpush.bf16.msra.mxu3 %v1184_v5  ;;  %v323_v5 = vld [vmem:[%s1502_s16 + $0xa8] sm:$0xff] }
  0x3f   : > { %647 = vmatpush.bf16.msra.mxu1 %v1190_v38 }
  0x42   : > { %424 = vmatpush.bf16.msra.mxu0 %v1183_v6  ;;  %1205 = vmatpush.bf16.msra.mxu3 %v1183_v6 }
  0x46   : > { %425 = vmatpush.bf16.msra.mxu0 %v1182_v7  ;;  %1206 = vmatpush.bf16.msra.mxu3 %v1182_v7  ;;  %v344_v7 = vpack.c.bf16 %v323_v5, %v322_v4 }
  0x49   : > { %426 = vmatmul.bf16.vlgmr.msra.gmra.mxu0 %v334_v10  ;;  %486 = vmatmul.bf16.vlgmr.msra.gmra.mxu3 %v346_v25 }
  0x4a   : > { %1207 = vmatpush.bf16.msrb.mxu3 %v1193_v34 }
  0x4e   : > { %1208 = vmatpush.bf16.msrb.mxu3 %v1192_v36 }
  0x52   : > { %1209 = vmatpush.bf16.msrb.mxu3 %v1191_v37 }
  0x56   : > { %1210 = vmatpush.bf16.msrb.mxu3 %v1190_v38 }
  0x59   : > { %431 = vmatmul.bf16.gmra.mxu0 %v335_v13  ;;  %491 = vmatmul.bf16.gmra.mxu3 %v347_v31 }
  0x69   : > { %436 = vmatmul.bf16.gmra.mxu0 %v336_v16  ;;  %496 = vmatmul.bf16.gmra.mxu3 %v348_v43 }
  0x79   : > { %441 = vmatmul.bf16.gmra.mxu0 %v337_v19  ;;  %501 = vmatmul.bf16.gmra.mxu3 %v349_v49 }
  0x89   : > { %446 = vmatmul.bf16.gmra.mxu0 %v338_v22 }
  0x99   : > { %451 = vmatmul.bf16.gmra.mxu0 %v339_v28 }
  0xa9   : > { %456 = vmatmul.bf16.gmra.mxu0 %v340_v35 }
  0xb9   : > { %461 = vmatmul.bf16.gmra.mxu0 %v341_v44 }
  0xc6   : > { %v427_v51 = vpop.f32.mrf.mxu0 }
  0xc7   : > { %v428_v53 = vadd.f32 %v1573_v52, %v427_v51 }
  0xc9   : > { %466 = vmatmul.bf16.gmra.mxu0 %v342_v50  ;;  %v507_v56 = vmax.f32 %v428_v53, 0.0 }
  0xcc   : > { %v487_v33 = vpop.f32.mrf.mxu3 }
  0xcd   : > { %v488_v37 = vadd.f32 %v1573_v52, %v487_v33 }
  0xce   : > { %v429_v54 = vpop.f32.mrf.mxu0 }
  0xcf   : > { %v430_v55 = vadd.f32 %v1573_v52, %v429_v54  ;;  %v531_v42 = vmax.f32 %v488_v37, 0.0  ;;  %v1197_v54 = vld [vmem:[%s1809_s5 + $0x18] sm:$0xff] }
  0xd0   : > { %865 = vmatpush.bf16.msra.mxu2 %v1197_v54  ;;  %1211 = vmatpush.bf16.msra.mxu3 %v1197_v54 }
  0xd1   : > { %v508_v57 = vmax.f32 %v430_v55, 0.0 }
  0xd3   : > { %v539_v60 = vpack.c.bf16 %v508_v57, %v507_v56 }
  0xd4   : > { %v489_v38 = vpop.f32.mrf.mxu3 }
  0xd5   : > { %1128 = vmatmul.msk.bf16.vlgmr.msra.gmra.mxu1 %vm591_vm0, %v539_v60  ;;  %v490_v43 = vadd.f32 %v1573_v52, %v489_v38 }
  0xd6   : > { %v432_v62 = vpop.f32.mrf.mxu0 }
  0xd7   : > { %v433_v63 = vadd.f32 %v1573_v52, %v432_v62  ;;  %v532_v44 = vmax.f32 %v490_v43, 0.0 }
  0xd9   : > { %471 = vmatmul.bf16.gmra.mxu0 %v343_v61  ;;  %v509_v2 = vmax.f32 %v433_v63, 0.0  ;;  %v1601_v46 = vpack.c.bf16 %v532_v44, %v531_v42  ;;  %v1196_v61 = vld [vmem:[%s1809_s5 + $0x10] sm:$0xff] }
  0xda   : > { %866 = vmatpush.bf16.msra.mxu2 %v1196_v61  ;;  %1212 = vmatpush.bf16.msra.mxu3 %v1196_v61 }
  0xdc   : > { %v492_v47 = vpop.f32.mrf.mxu3 }
  0xdd   : > { %v493_v49 = vadd.f32 %v1573_v52, %v492_v47 }
  0xde   : > { %v434_v0 = vpop.f32.mrf.mxu0 }
  0xdf   : > { %v435_v1 = vadd.f32 %v1573_v52, %v434_v0  ;;  %v533_v57 = vmax.f32 %v493_v49, 0.0 }
  0xe1   : > { %v510_v3 = vmax.f32 %v435_v1, 0.0  ;;  %v1195_v1 = vld [vmem:[%s1809_s5 + $0x8] sm:$0xff] }
  0xe2   : > { %867 = vmatpush.bf16.msra.mxu2 %v1195_v1  ;;  %1213 = vmatpush.bf16.msra.mxu3 %v1195_v1 }
  0xe3   : > { %v540_v6 = vpack.c.bf16 %v510_v3, %v509_v2  ;;  %v1194_v2 = vld [vmem:[%s1809_s5] sm:$0xff] }
  0xe4   : > { %v494_v53 = vpop.f32.mrf.mxu3 }
  0xe5   : > { %1129 = vmatmul.msk.bf16.gmra.mxu1 %vm591_vm0, %v540_v6  ;;  %v495_v58 = vadd.f32 %v1573_v52, %v494_v53 }
  0xe6   : > { %v437_v8 = vpop.f32.mrf.mxu0  ;;  %868 = vmatpush.bf16.msra.mxu2 %v1194_v2  ;;  %1214 = vmatpush.bf16.msra.mxu3 %v1194_v2 }
  0xe7   : > { %v438_v9 = vadd.f32 %v1573_v52, %v437_v8  ;;  %v534_v60 = vmax.f32 %v495_v58, 0.0 }
  0xe9   : > { %476 = vmatmul.bf16.gmra.mxu0 %v344_v7  ;;  %v511_v12 = vmax.f32 %v438_v9, 0.0  ;;  %v552_v62 = vpack.c.bf16 %v534_v60, %v533_v57 }
  0xeb   : > { %1141 = vmatmul.msk.bf16.vlgmr.msrb.gmra.mxu3 %vm591_vm0, %v552_v62 }
  0xec   : > { %v497_v0 = vpop.f32.mrf.mxu3 }
  0xed   : > { %v498_v4 = vadd.f32 %v1573_v52, %v497_v0 }
  0xee   : > { %v439_v10 = vpop.f32.mrf.mxu0 }
  0xef   : > { %v440_v11 = vadd.f32 %v1573_v52, %v439_v10  ;;  %v535_v10 = vmax.f32 %v498_v4, 0.0 }
  0xf1   : > { %v512_v13 = vmax.f32 %v440_v11, 0.0 }
  0xf3   : > { %v541_v16 = vpack.c.bf16 %v512_v13, %v511_v12 }
  0xf4   : > { %v499_v7 = vpop.f32.mrf.mxu3 }
  0xf5   : > { %1130 = vmatmul.msk.bf16.gmra.mxu1 %vm591_vm0, %v541_v16  ;;  %v500_v11 = vadd.f32 %v1573_v52, %v499_v7 }
  0xf6   : > { %v442_v18 = vpop.f32.mrf.mxu0 }
  0xf7   : > { %v443_v19 = vadd.f32 %v1573_v52, %v442_v18  ;;  %v536_v13 = vmax.f32 %v500_v11, 0.0 }
  0xf9   : > { %481 = vmatmul.bf16.gmra.mxu0 %v345_v17  ;;  %v513_v22 = vmax.f32 %v443_v19, 0.0  ;;  %v553_v14 = vpack.c.bf16 %v536_v13, %v535_v10 }
  0xfb   : > { %1142 = vmatmul.msk.bf16.gmra.mxu3 %vm591_vm0, %v553_v14 }
  0xfc   : > { %v502_v16 = vpop.f32.mrf.mxu3 }
  0xfd   : > { %v503_v18 = vadd.f32 %v1573_v52, %v502_v16 }
  0xfe   : > { %v444_v20 = vpop.f32.mrf.mxu0 }
  0xff   : > { %v445_v21 = vadd.f32 %v1573_v52, %v444_v20 }
 0x101   : > { %v514_v23 = vmax.f32 %v445_v21, 0.0 }
 0x103   : > { %v542_v24 = vpack.c.bf16 %v514_v23, %v513_v22 }
 0x104   : > { %v504_v21 = vpop.f32.mrf.mxu3 }
 0x105   : > { %1131 = vmatmul.msk.bf16.gmra.mxu1 %vm591_vm0, %v542_v24  ;;  %v537_v24 = vmax.f32 %v503_v18, 0.0 }
 0x106   : > { %v447_v25 = vpop.f32.mrf.mxu0 }
 0x107   : > { %v448_v26 = vadd.f32 %v1573_v52, %v447_v25  ;;  %v505_v25 = vadd.f32 %v1573_v52, %v504_v21 }
 0x109   : > { %v515_v29 = vmax.f32 %v448_v26, 0.0 }
 0x10e   : > { %v449_v27 = vpop.f32.mrf.mxu0 }
 0x10f   : > { %v450_v28 = vadd.f32 %v1573_v52, %v449_v27 }
 0x111   : > { %v516_v30 = vmax.f32 %v450_v28, 0.0  ;;  %v538_v28 = vmax.f32 %v505_v25, 0.0 }
 0x113   : > { %v543_v31 = vpack.c.bf16 %v516_v30, %v515_v29  ;;  %v1634_v29 = vld [vmem:[%s1808_s4] ss:$0 sm:$0xff]  ;;  %v554_v30 = vpack.c.bf16 %v538_v28, %v537_v24 }
 0x115   : > { %1132 = vmatmul.msk.bf16.gmra.mxu1 %vm591_vm0, %v543_v31  ;;  %1143 = vmatmul.msk.bf16.gmra.mxu3 %vm591_vm0, %v554_v30 }
 0x116   : > { %v452_v32 = vpop.f32.mrf.mxu0 }
 0x117   : > { %v453_v34 = vadd.f32 %v1573_v52, %v452_v32 }
 0x119   : > { %v517_v39 = vmax.f32 %v453_v34, 0.0 }
 0x11e   : > { %v454_v35 = vpop.f32.mrf.mxu0 }
 0x11f   : > { %v455_v36 = vadd.f32 %v1573_v52, %v454_v35 }
 0x121   : > { %v518_v40 = vmax.f32 %v455_v36, 0.0 }
 0x123   : > { %v544_v41 = vpack.c.bf16 %v518_v40, %v517_v39 }
 0x125   : > { %1133 = vmatmul.msk.bf16.gmra.mxu1 %vm591_vm0, %v544_v41 }
 0x126   : > { %v457_v45 = vpop.f32.mrf.mxu0 }
 0x127   : > { %v458_v48 = vadd.f32 %v1573_v52, %v457_v45 }
 0x129   : > { %v519_v55 = vmax.f32 %v458_v48, 0.0 }
 0x12e   : > { %v459_v50 = vpop.f32.mrf.mxu0 }
 0x12f   : > { %v460_v51 = vadd.f32 %v1573_v52, %v459_v50 }
 0x131   : > { %v520_v56 = vmax.f32 %v460_v51, 0.0 }
 0x133   : > { %v545_v59 = vpack.c.bf16 %v520_v56, %v519_v55 }
 0x135   : > { %1134 = vmatmul.msk.bf16.gmra.mxu1 %vm591_vm0, %v545_v59 }
 0x136   : > { %v462_v63 = vpop.f32.mrf.mxu0 }
 0x137   : > { %v463_v3 = vadd.f32 %v1573_v52, %v462_v63 }
 0x139   : > { %v521_v8 = vmax.f32 %v463_v3, 0.0 }
 0x13e   : > { %v464_v5 = vpop.f32.mrf.mxu0 }
 0x13f   : > { %v465_v6 = vadd.f32 %v1573_v52, %v464_v5 }
 0x141   : > { %v522_v9 = vmax.f32 %v465_v6, 0.0 }
 0x143   : > { %v546_v12 = vpack.c.bf16 %v522_v9, %v521_v8 }
 0x145   : > { %1135 = vmatmul.msk.bf16.gmra.mxu1 %vm591_vm0, %v546_v12 }
 0x146   : > { %v467_v15 = vpop.f32.mrf.mxu0 }
 0x147   : > { %v468_v17 = vadd.f32 %v1573_v52, %v467_v15 }
 0x149   : > { %v523_v22 = vmax.f32 %v468_v17, 0.0 }
 0x14e   : > { %v469_v19 = vpop.f32.mrf.mxu0 }
 0x14f   : > { %v470_v20 = vadd.f32 %v1573_v52, %v469_v19 }
 0x151   : > { %v524_v23 = vmax.f32 %v470_v20, 0.0 }
 0x152   : > { %v649_v26 = vpop.f32.mrf.mxu1 }
 0x153   : > { %v547_v27 = vpack.c.bf16 %v524_v23, %v523_v22  ;;  %v650_v32 = vadd.f32 %v1634_v29, %v649_v26 }
 0x155   : > { %1136 = vmatmul.msk.bf16.gmra.mxu1 %vm591_vm0, %v547_v27  ;;  %v729_v35 = vmax.f32 %v650_v32, 0.0 }
 0x156   : > { %v472_v31 = vpop.f32.mrf.mxu0 }
 0x157   : > { %v473_v36 = vadd.f32 %v1573_v52, %v472_v31 }
 0x159   : > { %v525_v41 = vmax.f32 %v473_v36, 0.0 }
 0x15a   : > { %v651_v33 = vpop.f32.mrf.mxu1 }
 0x15b   : > { %v652_v34 = vadd.f32 %v1634_v29, %v651_v33 }
 0x15d   : > { %v730_v37 = vmax.f32 %v652_v34, 0.0 }
 0x15e   : > { %v474_v38 = vpop.f32.mrf.mxu0 }
 0x15f   : > { %v475_v39 = vadd.f32 %v1573_v52, %v474_v38  ;;  %v761_v40 = vpack.c.bf16 %v730_v37, %v729_v35 }
 0x161   : > { %v526_v42 = vmax.f32 %v475_v39, 0.0  ;;  %1160 = vmatmul.msk.bf16.vlgmr.msra.gmra.mxu2 %vm591_vm0, %v761_v40 }
 0x162   : > { %v654_v43 = vpop.f32.mrf.mxu1 }
 0x163   : > { %v548_v44 = vpack.c.bf16 %v526_v42, %v525_v41  ;;  %v655_v47 = vadd.f32 %v1634_v29, %v654_v43 }
 0x165   : > { %1137 = vmatmul.msk.bf16.gmra.mxu1 %vm591_vm0, %v548_v44  ;;  %v731_v50 = vmax.f32 %v655_v47, 0.0 }
 0x166   : > { %v477_v45 = vpop.f32.mrf.mxu0 }
 0x167   : > { %v478_v51 = vadd.f32 %v1573_v52, %v477_v45 }
 0x169   : > { %v527_v57 = vmax.f32 %v478_v51, 0.0 }
 0x16a   : > { %v656_v48 = vpop.f32.mrf.mxu1 }
 0x16b   : > { %v657_v49 = vadd.f32 %v1634_v29, %v656_v48 }
 0x16d   : > { %v732_v53 = vmax.f32 %v657_v49, 0.0 }
 0x16e   : > { %v479_v54 = vpop.f32.mrf.mxu0  ;;  %v714_v33 = vpop.f32.mrf.mxu3 }
 0x16f   : > { %v762_v55 = vpack.c.bf16 %v732_v53, %v731_v50  ;;  %v480_v56 = vadd.f32 %v1573_v52, %v479_v54  ;;  %v715_v38 = vadd.f32 %v1634_v29, %v714_v33 }
 0x171   : > { %v528_v58 = vmax.f32 %v480_v56, 0.0  ;;  %1161 = vmatmul.msk.bf16.gmra.mxu2 %vm591_vm0, %v762_v55  ;;  %v755_v41 = vmax.f32 %v715_v38, 0.0 }
 0x172   : > { %v659_v59 = vpop.f32.mrf.mxu1 }
 0x173   : > { %v549_v60 = vpack.c.bf16 %v528_v58, %v527_v57  ;;  %v660_v62 = vadd.f32 %v1634_v29, %v659_v59 }
 0x175   : > { %1138 = vmatmul.msk.bf16.gmra.mxu1 %vm591_vm0, %v549_v60  ;;  %v733_v1 = vmax.f32 %v660_v62, 0.0 }
 0x176   : > { %v482_v61 = vpop.f32.mrf.mxu0  ;;  %v716_v40 = vpop.f32.mrf.mxu3 }
 0x177   : > { %v483_v2 = vadd.f32 %v1573_v52, %v482_v61  ;;  %v717_v42 = vadd.f32 %v1634_v29, %v716_v40 }
 0x179   : > { %v529_v7 = vmax.f32 %v483_v2, 0.0  ;;  %v756_v43 = vmax.f32 %v717_v42, 0.0 }
 0x17a   : > { %v661_v63 = vpop.f32.mrf.mxu1 }
 0x17b   : > { %v662_v0 = vadd.f32 %v1634_v29, %v661_v63  ;;  %v774_v44 = vpack.c.bf16 %v756_v43, %v755_v41 }
 0x17d   : > { %v734_v3 = vmax.f32 %v662_v0, 0.0  ;;  %1173 = vmatmul.msk.bf16.vlgmr.msra.gmra.mxu3 %vm591_vm0, %v774_v44 }
 0x17e   : > { %v484_v4 = vpop.f32.mrf.mxu0  ;;  %v719_v48 = vpop.f32.mrf.mxu3 }
 0x17f   : > { %v763_v5 = vpack.c.bf16 %v734_v3, %v733_v1  ;;  %v485_v6 = vadd.f32 %v1573_v52, %v484_v4  ;;  %v720_v54 = vadd.f32 %v1634_v29, %v719_v48 }
 0x181   : > { %v530_v8 = vmax.f32 %v485_v6, 0.0  ;;  %1162 = vmatmul.msk.bf16.gmra.mxu2 %vm591_vm0, %v763_v5  ;;  %v757_v57 = vmax.f32 %v720_v54, 0.0  ;;  %v1686_v5 = vld [vmem:[%s1810_s6] ss:$0 sm:$0xff] }
 0x182   : > { %v664_v9 = vpop.f32.mrf.mxu1 }
 0x183   : > { %v550_v10 = vpack.c.bf16 %v530_v8, %v529_v7  ;;  %v665_v11 = vadd.f32 %v1634_v29, %v664_v9 }
 0x185   : > { %1139 = vmatmul.msk.bf16.gmra.mxu1 %vm591_vm0, %v550_v10  ;;  %v735_v14 = vmax.f32 %v665_v11, 0.0 }
 0x186   : > { %v721_v56 = vpop.f32.mrf.mxu3 }
 0x187   : > { %v722_v58 = vadd.f32 %v1634_v29, %v721_v56 }
 0x189   : > { %v758_v59 = vmax.f32 %v722_v58, 0.0 }
 0x18a   : > { %v666_v12 = vpop.f32.mrf.mxu1 }
 0x18b   : > { %v667_v13 = vadd.f32 %v1634_v29, %v666_v12  ;;  %v775_v60 = vpack.c.bf16 %v758_v59, %v757_v57 }
 0x18d   : > { %v736_v15 = vmax.f32 %v667_v13, 0.0  ;;  %1174 = vmatmul.msk.bf16.gmra.mxu3 %vm591_vm0, %v775_v60 }
 0x18f   : > { %v764_v16 = vpack.c.bf16 %v736_v15, %v735_v14 }
 0x191   : > { %1163 = vmatmul.msk.bf16.gmra.mxu2 %vm591_vm0, %v764_v16 }
 0x192   : > { %v669_v17 = vpop.f32.mrf.mxu1 }
 0x193   : > { %v670_v52 = vadd.f32 %v1634_v29, %v669_v17 }
 0x195   : > { %1140 = vmatmul.msk.bf16.gmra.mxu1 %vm591_vm0, %v1601_v46  ;;  %v737_v20 = vmax.f32 %v670_v52, 0.0 }
 0x198   : > { %v724_v63 = vpop.f32.mrf.mxu3 }
 0x199   : > { %v725_v4 = vadd.f32 %v1634_v29, %v724_v63 }
 0x19a   : > { %v671_v18 = vpop.f32.mrf.mxu1 }
 0x19b   : > { %v672_v19 = vadd.f32 %v1634_v29, %v671_v18  ;;  %v759_v8 = vmax.f32 %v725_v4, 0.0 }
 0x19d   : > { %v738_v21 = vmax.f32 %v672_v19, 0.0 }
 0x19f   : > { %v765_v22 = vpack.c.bf16 %v738_v21, %v737_v20 }
 0x1a0   : > { %v726_v7 = vpop.f32.mrf.mxu3 }
 0x1a1   : > { %1164 = vmatmul.msk.bf16.gmra.mxu2 %vm591_vm0, %v765_v22  ;;  %v727_v9 = vadd.f32 %v1634_v29, %v726_v7 }
 0x1a2   : > { %v674_v23 = vpop.f32.mrf.mxu1 }
 0x1a3   : > { %v675_v24 = vadd.f32 %v1634_v29, %v674_v23  ;;  %v760_v12 = vmax.f32 %v727_v9, 0.0 }
 0x1a5   : > { %v739_v27 = vmax.f32 %v675_v24, 0.0  ;;  %v776_v13 = vpack.c.bf16 %v760_v12, %v759_v8 }
 0x1a7   : > { %1175 = vmatmul.msk.bf16.gmra.mxu3 %vm591_vm0, %v776_v13 }
 0x1aa   : > { %v676_v25 = vpop.f32.mrf.mxu1 }
 0x1ab   : > { %v677_v26 = vadd.f32 %v1634_v29, %v676_v25 }
 0x1ad   : > { %v740_v28 = vmax.f32 %v677_v26, 0.0 }
 0x1af   : > { %v766_v30 = vpack.c.bf16 %v740_v28, %v739_v27 }
 0x1b1   : > { %1165 = vmatmul.msk.bf16.gmra.mxu2 %vm591_vm0, %v766_v30 }
 0x1b2   : > { %v679_v46 = vpop.f32.mrf.mxu1 }
 0x1b3   : > { %v680_v31 = vadd.f32 %v1634_v29, %v679_v46 }
 0x1b5   : > { %v741_v35 = vmax.f32 %v680_v31, 0.0 }
 0x1ba   : > { %v681_v32 = vpop.f32.mrf.mxu1 }
 0x1bb   : > { %v682_v34 = vadd.f32 %v1634_v29, %v681_v32 }
 0x1bd   : > { %v742_v36 = vmax.f32 %v682_v34, 0.0 }
 0x1bf   : > { %v767_v37 = vpack.c.bf16 %v742_v36, %v741_v35 }
 0x1c1   : > { %1166 = vmatmul.msk.bf16.gmra.mxu2 %vm591_vm0, %v767_v37 }
 0x1c2   : > { %v684_v39 = vpop.f32.mrf.mxu1 }
 0x1c3   : > { %v685_v45 = vadd.f32 %v1634_v29, %v684_v39 }
 0x1c5   : > { %v743_v50 = vmax.f32 %v685_v45, 0.0 }
 0x1ca   : > { %v686_v47 = vpop.f32.mrf.mxu1 }
 0x1cb   : > { %v687_v49 = vadd.f32 %v1634_v29, %v686_v47 }
 0x1cd   : > { %v744_v51 = vmax.f32 %v687_v49, 0.0 }
 0x1cf   : > { %v768_v53 = vpack.c.bf16 %v744_v51, %v743_v50 }
 0x1d1   : > { %1167 = vmatmul.msk.bf16.gmra.mxu2 %vm591_vm0, %v768_v53 }
 0x1d2   : > { %v689_v55 = vpop.f32.mrf.mxu1 }
 0x1d3   : > { %v690_v61 = vadd.f32 %v1634_v29, %v689_v55 }
 0x1d5   : > { %v745_v1 = vmax.f32 %v690_v61, 0.0 }
 0x1da   : > { %v691_v62 = vpop.f32.mrf.mxu1 }
 0x1db   : > { %v692_v0 = vadd.f32 %v1634_v29, %v691_v62 }
 0x1dd   : > { %v746_v2 = vmax.f32 %v692_v0, 0.0 }
 0x1df   : > { %v769_v3 = vpack.c.bf16 %v746_v2, %v745_v1 }
 0x1e1   : > { %1168 = vmatmul.msk.bf16.gmra.mxu2 %vm591_vm0, %v769_v3 }
 0x1e2   : > { %v694_v6 = vpop.f32.mrf.mxu1 }
 0x1e3   : > { %v695_v14 = vadd.f32 %v1634_v29, %v694_v6 }
 0x1e4   : > { %v870_v10 = vpop.f32.mrf.mxu2 }
 0x1e5   : > { %v871_v11 = vadd.f32 %v1686_v5, %v870_v10  ;;  %v747_v52 = vmax.f32 %v695_v14, 0.0 }
 0x1e7   : > { %950 = vst [vmem:[%s1692_s23] sm:$0xff] %v871_v11 }
 0x1ea   : > { %v696_v15 = vpop.f32.mrf.mxu1 }
 0x1eb   : > { %v697_v16 = vadd.f32 %v1634_v29, %v696_v15 }
 0x1ec   : > { %v872_v17 = vpop.f32.mrf.mxu2 }
 0x1ed   : > { %v748_v18 = vmax.f32 %v697_v16, 0.0  ;;  %v873_v19 = vadd.f32 %v1686_v5, %v872_v17 }
 0x1ef   : > { %v770_v20 = vpack.c.bf16 %v748_v18, %v747_v52  ;;  %951 = vst [vmem:[%s1692_s23 + $0x8] sm:$0xff] %v873_v19 }
 0x1f1   : > { %1169 = vmatmul.msk.bf16.gmra.mxu2 %vm591_vm0, %v770_v20 }
 0x1f2   : > { %v699_v21 = vpop.f32.mrf.mxu1 }
 0x1f3   : > { %v700_v24 = vadd.f32 %v1634_v29, %v699_v21 }
 0x1f4   : > { %v875_v22 = vpop.f32.mrf.mxu2 }
 0x1f5   : > { %v876_v23 = vadd.f32 %v1686_v5, %v875_v22  ;;  %v749_v28 = vmax.f32 %v700_v24, 0.0 }
 0x1f7   : > { %952 = vst [vmem:[%s1692_s23 + $0x10] sm:$0xff] %v876_v23 }
 0x1fa   : > { %v701_v25 = vpop.f32.mrf.mxu1 }
 0x1fb   : > { %v702_v26 = vadd.f32 %v1634_v29, %v701_v25 }
 0x1fc   : > { %v877_v27 = vpop.f32.mrf.mxu2 }
 0x1fd   : > { %v750_v30 = vmax.f32 %v702_v26, 0.0  ;;  %v878_v46 = vadd.f32 %v1686_v5, %v877_v27 }
 0x1ff   : > { %v771_v31 = vpack.c.bf16 %v750_v30, %v749_v28  ;;  %953 = vst [vmem:[%s1692_s23 + $0x18] sm:$0xff] %v878_v46 }
 0x200   : > { %v935_v2 = vpop.f32.mrf.mxu3 }
 0x201   : > { %1170 = vmatmul.msk.bf16.gmra.mxu2 %vm591_vm0, %v771_v31  ;;  %v936_v4 = vadd.f32 %v1686_v5, %v935_v2 }
 0x202   : > { %v704_v32 = vpop.f32.mrf.mxu1 }
 0x203   : > { %v705_v35 = vadd.f32 %v1634_v29, %v704_v32  ;;  %976 = vst [vmem:[%s1692_s23 + $0xd0] sm:$0xff] %v936_v4 }
 0x204   : > { %v880_v33 = vpop.f32.mrf.mxu2 }
 0x205   : > { %v881_v34 = vadd.f32 %v1686_v5, %v880_v33  ;;  %v751_v39 = vmax.f32 %v705_v35, 0.0 }
 0x207   : > { %954 = vst [vmem:[%s1692_s23 + $0x20] sm:$0xff] %v881_v34 }
 0x208   : > { %v937_v7 = vpop.f32.mrf.mxu3 }
 0x209   : > { %v938_v9 = vadd.f32 %v1686_v5, %v937_v7 }
 0x20a   : > { %v706_v36 = vpop.f32.mrf.mxu1 }
 0x20b   : > { %v707_v37 = vadd.f32 %v1634_v29, %v706_v36  ;;  %977 = vst [vmem:[%s1692_s23 + $0xd8] sm:$0xff] %v938_v9 }
 0x20c   : > { %v882_v38 = vpop.f32.mrf.mxu2 }
 0x20d   : > { %v752_v40 = vmax.f32 %v707_v37, 0.0  ;;  %v883_v41 = vadd.f32 %v1686_v5, %v882_v38 }
 0x20f   : > { %v772_v42 = vpack.c.bf16 %v752_v40, %v751_v39  ;;  %955 = vst [vmem:[%s1692_s23 + $0x28] sm:$0xff] %v883_v41 }
 0x210   : > { %v940_v11 = vpop.f32.mrf.mxu3 }
 0x211   : > { %1171 = vmatmul.msk.bf16.gmra.mxu2 %vm591_vm0, %v772_v42  ;;  %v941_v13 = vadd.f32 %v1686_v5, %v940_v11 }
 0x212   : > { %v709_v43 = vpop.f32.mrf.mxu1 }
 0x213   : > { %v710_v47 = vadd.f32 %v1634_v29, %v709_v43  ;;  %978 = vst [vmem:[%s1692_s23 + $0xe0] sm:$0xff] %v941_v13 }
 0x214   : > { %v885_v44 = vpop.f32.mrf.mxu2 }
 0x215   : > { %v886_v45 = vadd.f32 %v1686_v5, %v885_v44  ;;  %v753_v51 = vmax.f32 %v710_v47, 0.0 }
 0x217   : > { %956 = vst [vmem:[%s1692_s23 + $0x30] sm:$0xff] %v886_v45 }
 0x218   : > { %v942_v15 = vpop.f32.mrf.mxu3 }
 0x219   : > { %v943_v17 = vadd.f32 %v1686_v5, %v942_v15 }
 0x21a   : > { %v711_v48 = vpop.f32.mrf.mxu1 }
 0x21b   : > { %v712_v49 = vadd.f32 %v1634_v29, %v711_v48  ;;  %979 = vst [vmem:[%s1692_s23 + $0xe8] sm:$0xff] %v943_v17 }
 0x21c   : > { %v887_v50 = vpop.f32.mrf.mxu2 }
 0x21d   : > { %v754_v53 = vmax.f32 %v712_v49, 0.0  ;;  %v888_v54 = vadd.f32 %v1686_v5, %v887_v50 }
 0x21f   : > { %v773_v55 = vpack.c.bf16 %v754_v53, %v753_v51  ;;  %957 = vst [vmem:[%s1692_s23 + $0x38] sm:$0xff] %v888_v54 }
 0x221   : > { %1172 = vmatmul.msk.bf16.gmra.mxu2 %vm591_vm0, %v773_v55 }
 0x224   : > { %v890_v56 = vpop.f32.mrf.mxu2 }
 0x225   : > { %v891_v57 = vadd.f32 %v1686_v5, %v890_v56 }
 0x227   : > { %958 = vst [vmem:[%s1692_s23 + $0x40] sm:$0xff] %v891_v57 }
 0x22a   : > { %v945_v18 = vpop.f32.mrf.mxu3 }
 0x22b   : > { %v946_v20 = vadd.f32 %v1686_v5, %v945_v18 }
 0x22c   : > { %v892_v58 = vpop.f32.mrf.mxu2 }
 0x22d   : > { %v893_v29 = vadd.f32 %v1686_v5, %v892_v58  ;;  %980 = vst [vmem:[%s1692_s23 + $0xf0] sm:$0xff] %v946_v20 }
 0x22f   : > { %959 = vst [vmem:[%s1692_s23 + $0x48] sm:$0xff] %v893_v29 }
 0x232   : > { %v947_v22 = vpop.f32.mrf.mxu3 }
 0x233   : > { %v948_v24 = vadd.f32 %v1686_v5, %v947_v22 }
 0x234   : > { %v895_v59 = vpop.f32.mrf.mxu2 }
 0x235   : > { %v896_v60 = vadd.f32 %v1686_v5, %v895_v59  ;;  %981 = vst [vmem:[%s1692_s23 + $0xf8] sm:$0xff] %v948_v24 }
 0x237   : > { %960 = vst [vmem:[%s1692_s23 + $0x50] sm:$0xff] %v896_v60 }
 0x23c   : > { %v897_v61 = vpop.f32.mrf.mxu2 }
 0x23d   : > { %v898_v62 = vadd.f32 %v1686_v5, %v897_v61 }
 0x23f   : > { %961 = vst [vmem:[%s1692_s23 + $0x58] sm:$0xff] %v898_v62 }
 0x244   : > { %v900_v63 = vpop.f32.mrf.mxu2 }
 0x245   : > { %v901_v0 = vadd.f32 %v1686_v5, %v900_v63 }
 0x247   : > { %962 = vst [vmem:[%s1692_s23 + $0x60] sm:$0xff] %v901_v0 }
 0x24c   : > { %v902_v1 = vpop.f32.mrf.mxu2 }
 0x24d   : > { %v903_v3 = vadd.f32 %v1686_v5, %v902_v1 }
 0x24f   : > { %963 = vst [vmem:[%s1692_s23 + $0x68] sm:$0xff] %v903_v3 }
 0x254   : > { %v905_v6 = vpop.f32.mrf.mxu2 }
 0x255   : > { %v906_v8 = vadd.f32 %v1686_v5, %v905_v6 }
 0x257   : > { %964 = vst [vmem:[%s1692_s23 + $0x70] sm:$0xff] %v906_v8 }
 0x25c   : > { %v907_v10 = vpop.f32.mrf.mxu2 }
 0x25d   : > { %v908_v12 = vadd.f32 %v1686_v5, %v907_v10 }
 0x25f   : > { %965 = vst [vmem:[%s1692_s23 + $0x78] sm:$0xff] %v908_v12 }
 0x264   : > { %v910_v14 = vpop.f32.mrf.mxu2 }
 0x265   : > { %v911_v16 = vadd.f32 %v1686_v5, %v910_v14 }
 0x267   : > { %966 = vst [vmem:[%s1692_s23 + $0x80] sm:$0xff] %v911_v16 }
 0x26c   : > { %v912_v52 = vpop.f32.mrf.mxu2 }
 0x26d   : > { %v913_v19 = vadd.f32 %v1686_v5, %v912_v52 }
 0x26f   : > { %967 = vst [vmem:[%s1692_s23 + $0x88] sm:$0xff] %v913_v19 }
 0x274   : > { %v915_v21 = vpop.f32.mrf.mxu2 }
 0x275   : > { %v916_v23 = vadd.f32 %v1686_v5, %v915_v21 }
 0x277   : > { %968 = vst [vmem:[%s1692_s23 + $0x90] sm:$0xff] %v916_v23 }
 0x27c   : > { %v917_v25 = vpop.f32.mrf.mxu2 }
 0x27d   : > { %v918_v26 = vadd.f32 %v1686_v5, %v917_v25 }
 0x27f   : > { %969 = vst [vmem:[%s1692_s23 + $0x98] sm:$0xff] %v918_v26 }
 0x284   : > { %v920_v27 = vpop.f32.mrf.mxu2 }
 0x285   : > { %v921_v28 = vadd.f32 %v1686_v5, %v920_v27 }
 0x287   : > { %970 = vst [vmem:[%s1692_s23 + $0xa0] sm:$0xff] %v921_v28 }
 0x28c   : > { %v922_v30 = vpop.f32.mrf.mxu2 }
 0x28d   : > { %v923_v46 = vadd.f32 %v1686_v5, %v922_v30 }
 0x28f   : > { %971 = vst [vmem:[%s1692_s23 + $0xa8] sm:$0xff] %v923_v46 }
 0x294   : > { %v925_v31 = vpop.f32.mrf.mxu2 }
 0x295   : > { %v926_v32 = vadd.f32 %v1686_v5, %v925_v31 }
 0x297   : > { %972 = vst [vmem:[%s1692_s23 + $0xb0] sm:$0xff] %v926_v32 }
 0x29c   : > { %v927_v33 = vpop.f32.mrf.mxu2 }
 0x29d   : > { %v928_v34 = vadd.f32 %v1686_v5, %v927_v33 }
 0x29f   : > { %973 = vst [vmem:[%s1692_s23 + $0xb8] sm:$0xff] %v928_v34 }
 0x2a4   : > { %v930_v35 = vpop.f32.mrf.mxu2 }
 0x2a5   : > { %v931_v36 = vadd.f32 %v1686_v5, %v930_v35 }
 0x2a7   : > { %974 = vst [vmem:[%s1692_s23 + $0xc0] sm:$0xff] %v931_v36 }
 0x2ac   : > { %v932_v37 = vpop.f32.mrf.mxu2 }
 0x2ad   : > { %v933_v38 = vadd.f32 %v1686_v5, %v932_v37 }
 0x2af   : > { %975 = vst [vmem:[%s1692_s23 + $0xc8] sm:$0xff] %v933_v38 }
 0x2b0   : > { %1325 = shalt.err (!%p1322_p4)
}
 0x2b1   : > { %s1368_s22 = smov 128   ;;  %s1369_s23 = smov 8  }
 0x2b2   : > { %1217 = dma.vmem_to_hbm [thread:$0]  (%p1460_p11), %s996_s17, 4096, %s998_s11, %s983_s12, %s1368_s22, %s1368_s22, %s1369_s23  }
 0x2b3 PF: > { %s1012_s10 = sand.u32 1, %s1352_s24   ;;  %p1818_p7 = scmp.ge.s32.totalorder %s1364_s27, 2 }
 0x2b4   : > { %s1013_s16 = scalar_lea.sflag [#allocation4], %s1012_s10 }
 0x2b5   : > { %p1224_p5 = pnand %p1818_p7, %p1464_p12 }
 0x2b7   : > { %p1225_p8 = pneg %p1224_p5 }
 0x2b9   : > { %1347 = dma.done.wait (%p1225_p8), %s1013_s16, 4096  }
 0x2ba   : > { %1349 = vsyncadd (%p1225_p8), %s1013_s16, 4294963200  ;;  %s1819_s29 = sld [smem:[#allocation8_spill]]  ;;  %p20_p10 = scmp.ge.s32.totalorder %s1435_s30, 4  }
 0x2bb   : > { %s1820_s24 = smov %s1356_s25  ;;  %s1821_s25 = smov %s1360_s26 }
 0x2bc   : > { %s1823_s27 = smov %s1435_s30  ;;  %22 = sbr.rel (!%p20_p10) target bundleno = 5 (0x5), region = 93 }
 0x2c0   : > { %s1822_s26 = smov %s1819_s29 }
 0x2c1   :  { %1019 = vsyncpa [#allocation3], 1 }
 0x2c2   :  { %1021 = vsyncpa [#allocation3 + $0x1], 1 }
 0x2c3   :  { %1022 = vsyncpa [#allocation4], 1 }
 0x2c4   :  { %1024 = vsyncpa [#allocation4 + $0x1], 1 }

</bundles_post_ra>
